<compile_context>
chip_gen: v5e
topology: v5e:2x2
jax: 0.10.0
libtpu: 0.0.40
codegen_flags: <defaults>
</compile_context>

<pallas_src>
import functools

import jax
import jax.numpy as jnp
from jax.experimental import pallas as pl
from jax.experimental.pallas import tpu as pltpu


def _cdiv(a, b):
    return -(-a // b)


def _round_up(x, m):
    return ((x + m - 1) // m) * m


def _block_diag(a, b):
    m1, n1 = a.shape
    m2, n2 = b.shape
    top = jnp.concatenate([a, jnp.zeros((m1, n2), a.dtype)], axis=1)
    bot = jnp.concatenate([jnp.zeros((m2, n1), b.dtype), b], axis=1)
    return jnp.concatenate([top, bot], axis=0)


def pack_fused_params(params):
    """Host-side packing: fuse actor+critic into 3 weights + 1 bias buffer."""
    aw1, ab1 = params["aw1"], params["ab1"]
    aw2, ab2 = params["aw2"], params["ab2"]
    aw3, ab3 = params["aw3"], params["ab3"]
    cw1, cb1 = params["cw1"], params["cb1"]
    cw2, cb2 = params["cw2"], params["cb2"]
    cw3, cb3 = params["cw3"], params["cb3"]

    n_act = aw3.shape[1]  # 2 (Discrete / len(layer_size)==2 path)

    W1 = jnp.concatenate([aw1, cw1], axis=1).astype(jnp.bfloat16)   # (D,    2*H1)
    W2 = _block_diag(aw2, cw2).astype(jnp.bfloat16)                 # (2*H1, 2*H2)
    # Final layer kept in f32: negligible cost, protects critic-value precision
    # (PPO advantage / GAE sensitivity noted in review).
    W3 = _block_diag(aw3, cw3).astype(jnp.float32)                  # (2*H2, n_act+1)

    h1x2, h2x2 = W1.shape[1], W2.shape[1]
    n_out = W3.shape[1]
    bw = max(h1x2, h2x2, n_out)
    bias = jnp.zeros((3, bw), jnp.float32)
    bias = bias.at[0, :h1x2].set(
        jnp.concatenate([ab1, cb1], axis=1)[0].astype(jnp.float32))
    bias = bias.at[1, :h2x2].set(
        jnp.concatenate([ab2, cb2], axis=1)[0].astype(jnp.float32))
    bias = bias.at[2, :n_out].set(
        jnp.concatenate([ab3, cb3], axis=1)[0].astype(jnp.float32))

    return dict(W1=W1, W2=W2, W3=W3, bias=bias, n_act=n_act)


def _fused_ppo_kernel(h1x2, h2x2, n_out,
                      x_ref, w1_ref, w2_ref, w3_ref, b_ref, o_ref):
    # x tile of the batch; bf16 operands into the MXU, f32 accumulation.
    x = x_ref[...].astype(jnp.bfloat16)                 # (TB, D)

    b1 = b_ref[0:1, 0:h1x2]                             # (1, 2*H1) f32
    b2 = b_ref[1:2, 0:h2x2]                             # (1, 2*H2) f32
    b3 = b_ref[2:3, 0:n_out]                            # (1, n_out) f32

    h = jnp.dot(x, w1_ref[...], preferred_element_type=jnp.float32) + b1
    h = jnp.maximum(h, 0.0).astype(jnp.bfloat16)        # ReLU, bf16 feed to next dot
    h = jnp.dot(h, w2_ref[...], preferred_element_type=jnp.float32) + b2
    h = jnp.maximum(h, 0.0)                             # stays f32 (value precision)
    out = jnp.dot(h, w3_ref[...], preferred_element_type=jnp.float32) + b3  # (TB, n_out)

    # Lane-dense writeback: (n_out, TB) unmasked store instead of per-row
    # 3-of-128 masked lane stores; XLU transpose slot is otherwise idle.
    o_ref[...] = out.T                                  # (n_out, TB)


def _choose_batch_tile(B, batch_tile):
    """Batch tile that is lane-dense for the transposed output (multiple of 128
    or == B), minimizes ragged waste, and yields >= 2 grid steps when B is big
    enough to shard across v7x's two TensorCores."""
    if B < 256:
        return B                                   # single full-dim block
    n_steps = max(2, _cdiv(B, batch_tile))         # >= 2 steps for megacore
    return _round_up(_cdiv(B, n_steps), 128)


def quantum_ppo_forward(state, fused, *, batch_tile=1024):
    """Classical-mode forward of QuantumPPOModel.

    Returns (logits (B, 2), value (B,)).  `state` may be f32 or bf16; passing
    bf16 (cast fused into the producer) halves the dominant input DMA.
    """
    W1, W2, W3, bias = fused["W1"], fused["W2"], fused["W3"], fused["bias"]
    n_act = fused["n_act"]

    B, D = state.shape
    h1x2 = W1.shape[1]
    h2x2 = W2.shape[1]
    n_out = W3.shape[1]

    tb = _choose_batch_tile(B, batch_tile)
    grid = (_cdiv(B, tb),)

    kern = functools.partial(_fused_ppo_kernel, h1x2, h2x2, n_out)

    out_t = pl.pallas_call(
        kern,
        grid=grid,
        in_specs=[
            pl.BlockSpec((tb, D), lambda i: (i, 0)),       # x streamed over batch
            pl.BlockSpec(W1.shape, lambda i: (0, 0)),      # weights stay resident
            pl.BlockSpec(W2.shape, lambda i: (0, 0)),
            pl.BlockSpec(W3.shape, lambda i: (0, 0)),
            pl.BlockSpec(bias.shape, lambda i: (0, 0)),
        ],
        # transposed, lane-dense output: (n_out, B)
        out_specs=pl.BlockSpec((n_out, tb), lambda i: (0, i)),
        out_shape=jax.ShapeDtypeStruct((n_out, B), jnp.float32),
        compiler_params=pltpu.CompilerParams(
            dimension_semantics=("parallel",)),            # shards across v7x's 2 TCs
    )(state, W1, W2, W3, bias)

    logits = out_t[:n_act, :].T            # (B, 2)
    value = out_t[n_act, :]                # (B,)  == critic(state).reshape(-1)
    return logits, value


def _init_linear(key, fan_in, fan_out):
    """Deterministic PyTorch-style nn.Linear init: U(-1/sqrt(fan_in), 1/sqrt(fan_in))."""
    kw, kb = jax.random.split(key)
    bound = 1.0 / jnp.sqrt(jnp.float32(fan_in))
    w = jax.random.uniform(kw, (fan_in, fan_out), jnp.float32, -bound, bound)
    b = jax.random.uniform(kb, (1, fan_out), jnp.float32, -bound, bound)
    return w, b


if __name__ == "__main__":
    key = jax.random.PRNGKey(0)
    D, H1, H2 = 16, 32, 32   # obs_dim, layer_size=[32, 32]

    keys = jax.random.split(key, 7)
    aw1, ab1 = _init_linear(keys[1], D, H1)
    aw2, ab2 = _init_linear(keys[2], H1, H2)
    aw3, ab3 = _init_linear(keys[3], H2, 2)   # actor head fixed to 2 (len(layer_size)==2 path)
    cw1, cb1 = _init_linear(keys[4], D, H1)
    cw2, cb2 = _init_linear(keys[5], H1, H2)
    cw3, cb3 = _init_linear(keys[6], H2, 1)

    params = dict(aw1=aw1, ab1=ab1, aw2=aw2, ab2=ab2, aw3=aw3, ab3=ab3,
                  cw1=cw1, cb1=cb1, cw2=cw2, cb2=cb2, cw3=cw3, cb3=cb3)
    fused = pack_fused_params(params)

    # reference check in plain JAX (f32 weights)
    def ref_mlp(x, w1, b1, w2, b2, w3, b3):
        h = jnp.maximum(x @ w1 + b1, 0.0)
        h = jnp.maximum(h @ w2 + b2, 0.0)
        return h @ w3 + b3

    # B=8  : single full-dim block (grid of 1)
    # B=300: 2-step grid with a ragged final block -> exercises the lane-dense
    #        transposed writeback and the no-host-pad path.
    for B in (8, 300):
        state = jax.random.normal(jax.random.fold_in(keys[0], B), (B, D), jnp.float32)
        logits, value = quantum_ppo_forward(state, fused)
        jax.block_until_ready((logits, value))

        ref_logits = ref_mlp(state, aw1, ab1, aw2, ab2, aw3, ab3)
        ref_value = ref_mlp(state, cw1, cb1, cw2, cb2, cw3, cb3).reshape(-1)

        assert logits.shape == (B, 2) and value.shape == (B,)
        # first two layers use bf16 weights on the MXU -> bf16-level tolerance
        assert jnp.allclose(logits, ref_logits, atol=2e-2, rtol=2e-2)
        assert jnp.allclose(value, ref_value, atol=2e-2, rtol=2e-2)

    print("KERNEL_OK")
</pallas_src>

<mosaic_0001>
module attributes {stable_mosaic.version = 11 : i64} {
  func.func @_fused_ppo_kernel(%arg0: i32, %arg1: memref<8x16xf32, #tpu.memory_space<vmem>>, %arg2: memref<16x64xbf16, #tpu.memory_space<vmem>>, %arg3: memref<64x64xbf16, #tpu.memory_space<vmem>>, %arg4: memref<64x3xf32, #tpu.memory_space<vmem>>, %arg5: memref<3x64xf32, #tpu.memory_space<vmem>>, %arg6: memref<3x8xf32, #tpu.memory_space<vmem>>) attributes {dimension_semantics = [#tpu.dimension_semantics<parallel>], iteration_bounds = array<i64: 1>, scalar_prefetch = 0 : i64, scratch_operands = 0 : i64, tpu.core_type = #tpu.core_type<tc>, window_params = [{transform_indices = @transform_0, window_bounds = array<i64: 8, 16>}, {pipeline_mode = #tpu.pipeline_mode<synchronous>, transform_indices = @transform_1, window_bounds = array<i64: 16, 64>}, {pipeline_mode = #tpu.pipeline_mode<synchronous>, transform_indices = @transform_2, window_bounds = array<i64: 64, 64>}, {pipeline_mode = #tpu.pipeline_mode<synchronous>, transform_indices = @transform_3, window_bounds = array<i64: 64, 3>}, {pipeline_mode = #tpu.pipeline_mode<synchronous>, transform_indices = @transform_4, window_bounds = array<i64: 3, 64>}, {transform_indices = @transform_5, window_bounds = array<i64: 3, 8>}]} {
    %c0 = arith.constant 0 : index
    %c0_0 = arith.constant 0 : index
    %0 = vector.load %arg1[%c0, %c0_0] : memref<8x16xf32, #tpu.memory_space<vmem>>, vector<8x16xf32>
    %1 = arith.truncf %0 : vector<8x16xf32> to vector<8x16xbf16>
    %c0_1 = arith.constant 0 : index
    %c0_2 = arith.constant 0 : index
    %2 = vector.load %arg5[%c0_1, %c0_2] : memref<3x64xf32, #tpu.memory_space<vmem>>, vector<1x64xf32>
    %c1 = arith.constant 1 : index
    %c0_3 = arith.constant 0 : index
    %3 = vector.load %arg5[%c1, %c0_3] : memref<3x64xf32, #tpu.memory_space<vmem>>, vector<1x64xf32>
    %c2 = arith.constant 2 : index
    %c0_4 = arith.constant 0 : index
    %4 = vector.load %arg5[%c2, %c0_4] : memref<3x64xf32, #tpu.memory_space<vmem>>, vector<1x3xf32>
    %c0_5 = arith.constant 0 : index
    %c0_6 = arith.constant 0 : index
    %5 = vector.load %arg2[%c0_5, %c0_6] : memref<16x64xbf16, #tpu.memory_space<vmem>>, vector<16x64xbf16>
    %cst = arith.constant dense<0.000000e+00> : vector<8x64xf32>
    %6 = tpu.matmul %1, %5, %cst {dimension_numbers = #tpu.dot_dimension_numbers<[1], [0], [0], [1], [0, 0, 1, 1], [], []>} : vector<8x16xbf16>, vector<16x64xbf16>, vector<8x64xf32> -> vector<8x64xf32>
    %7 = vector.broadcast %2 : vector<1x64xf32> to vector<8x64xf32>
    %8 = arith.addf %6, %7 : vector<8x64xf32>
    %cst_7 = arith.constant 0.000000e+00 : f32
    %9 = vector.broadcast %cst_7 : f32 to vector<8x64xf32>
    %10 = arith.maximumf %8, %9 : vector<8x64xf32>
    %11 = arith.truncf %10 : vector<8x64xf32> to vector<8x64xbf16>
    %c0_8 = arith.constant 0 : index
    %c0_9 = arith.constant 0 : index
    %12 = vector.load %arg3[%c0_8, %c0_9] : memref<64x64xbf16, #tpu.memory_space<vmem>>, vector<64x64xbf16>
    %cst_10 = arith.constant dense<0.000000e+00> : vector<8x64xf32>
    %13 = tpu.matmul %11, %12, %cst_10 {dimension_numbers = #tpu.dot_dimension_numbers<[1], [0], [0], [1], [0, 0, 1, 1], [], []>} : vector<8x64xbf16>, vector<64x64xbf16>, vector<8x64xf32> -> vector<8x64xf32>
    %14 = vector.broadcast %3 : vector<1x64xf32> to vector<8x64xf32>
    %15 = arith.addf %13, %14 : vector<8x64xf32>
    %cst_11 = arith.constant 0.000000e+00 : f32
    %16 = vector.broadcast %cst_11 : f32 to vector<8x64xf32>
    %17 = arith.maximumf %15, %16 : vector<8x64xf32>
    %c0_12 = arith.constant 0 : index
    %c0_13 = arith.constant 0 : index
    %18 = vector.load %arg4[%c0_12, %c0_13] : memref<64x3xf32, #tpu.memory_space<vmem>>, vector<64x3xf32>
    %cst_14 = arith.constant dense<0.000000e+00> : vector<8x3xf32>
    %19 = tpu.matmul %17, %18, %cst_14 {dimension_numbers = #tpu.dot_dimension_numbers<[1], [0], [0], [1], [0, 0, 1, 1], [], []>} : vector<8x64xf32>, vector<64x3xf32>, vector<8x3xf32> -> vector<8x3xf32>
    %20 = vector.broadcast %4 : vector<1x3xf32> to vector<8x3xf32>
    %21 = arith.addf %19, %20 : vector<8x3xf32>
    %22 = tpu.transpose %21, [1, 0] : vector<8x3xf32> -> vector<3x8xf32>
    %c0_15 = arith.constant 0 : index
    %c0_16 = arith.constant 0 : index
    %23 = vector.load %arg6[%c0_15, %c0_16] : memref<3x8xf32, #tpu.memory_space<vmem>>, vector<3x8xf32>
    tpu.vector_store %arg6[%c0_15, %c0_16], %22 {strides = array<i32>} : memref<3x8xf32, #tpu.memory_space<vmem>>, vector<3x8xf32>,
    return
  }
  func.func @transform_0(%arg0: i32) -> (i32, i32) {
    %c0_i32 = arith.constant 0 : i32
    %c0_i32_0 = arith.constant 0 : i32
    return %arg0, %c0_i32 : i32, i32
  }
  func.func @transform_1(%arg0: i32) -> (i32, i32) {
    %c0_i32 = arith.constant 0 : i32
    %c0_i32_0 = arith.constant 0 : i32
    %c0_i32_1 = arith.constant 0 : i32
    return %c0_i32, %c0_i32_0 : i32, i32
  }
  func.func @transform_2(%arg0: i32) -> (i32, i32) {
    %c0_i32 = arith.constant 0 : i32
    %c0_i32_0 = arith.constant 0 : i32
    %c0_i32_1 = arith.constant 0 : i32
    return %c0_i32, %c0_i32_0 : i32, i32
  }
  func.func @transform_3(%arg0: i32) -> (i32, i32) {
    %c0_i32 = arith.constant 0 : i32
    %c0_i32_0 = arith.constant 0 : i32
    %c0_i32_1 = arith.constant 0 : i32
    return %c0_i32, %c0_i32_0 : i32, i32
  }
  func.func @transform_4(%arg0: i32) -> (i32, i32) {
    %c0_i32 = arith.constant 0 : i32
    %c0_i32_0 = arith.constant 0 : i32
    %c0_i32_1 = arith.constant 0 : i32
    return %c0_i32, %c0_i32_0 : i32, i32
  }
  func.func @transform_5(%arg0: i32) -> (i32, i32) {
    %c0_i32 = arith.constant 0 : i32
    %c0_i32_0 = arith.constant 0 : i32
    return %c0_i32, %arg0 : i32, i32
  }
}

</mosaic_0001>

<bundles_post_ra>
// kernel: tpu_custom_call.1
= control target key start
LH: loop header
LB: loop body
LE: loop exit
PB: predicated region body
PF: predicated region fallthrough
CT: control target
= control target key end

     0   :  { %vm36_vm0 = vcmask 130048   ;;  %s332_s0 = inlined_call_operand.vmem [shape: f32[8,16], index: 0, kind: input, shape index: {}]   ;;  %s333_s1 = inlined_call_operand.vmem [shape: bf16[16,64], index: 1, kind: input, shape index: {}]   ;;  %s334_s2 = inlined_call_operand.vmem [shape: bf16[64,64], index: 2, kind: input, shape index: {}]   ;;  %s335_s3 = inlined_call_operand.vmem [shape: f32[64,3], index: 3, kind: input, shape index: {}]   ;;  %s336_s4 = inlined_call_operand.vmem [shape: f32[3,64], index: 4, kind: input, shape index: {}]   ;;  %s337_s5 = inlined_call_operand.hbm [shape: f32[3,8], index: 5, kind: output, shape index: {}]  }
   0x1   :  { %v211_v0 = vld [vmem:[%s333_s1] sm:$0xff]  ;;  %v215_v2 = vld [vmem:[%s334_s2 + $0x18] sm:$0xff]  ;;  %v214_v4 = vld [vmem:[%s334_s2 + $0x10] sm:$0xff] }
   0x2   :  { %v22_v1 = vld [vmem:[%s332_s0] sm:$0xff]  ;;  %47 = vmatpush.bf16.msra.mxu0 %v211_v0  ;;  %96 = vmatpush.bf16.msra.mxu1 %v215_v2 }
   0x3   :  { %v23_v3 = vpack.c.bf16 %v22_v1, %v22_v1 }
   0x4   :  { %10 = vsyncpa [#allocation3], 0  ;;  %v213_v5 = vld [vmem:[%s334_s2 + $0x8] sm:$0xff]  ;;  %v212_v6 = vld [vmem:[%s334_s2] sm:$0xff]  ;;  %vm88_vm1 = vcmask 523264   ;;  %s247_s24 = smov [#allocation2]  }
   0x5   :  { %192 = vmatmul.msk.bf16.vlgmr.msra.gmra.mxu0 %vm36_vm0, %v23_v3  ;;  %v113_v7 = vld [vmem:[%s335_s3 + $0x38] sm:$0xff]  ;;  %v112_v8 = vld [vmem:[%s335_s3 + $0x30] sm:$0xff]  ;;  %v111_v9 = vld [vmem:[%s335_s3 + $0x28] sm:$0xff]  ;;  %s177_s25 = sshll.u32 %s247_s24, 4  ;;  %s179_s26 = sshll.u32 %s337_s5, 4  ;;  %vm170_vm2 = vcmask 59392   ;;  %s178_s25 = int_to_ptr.vmem [resolvable:$true] %s177_s25  ;;  %s180_s26 = int_to_ptr.hbm [resolvable:$true] %s179_s26 }
   0x6   :  { %97 = vmatpush.bf16.msra.mxu1 %v214_v4  ;;  %126 = vmatpush.msra.mxu2 %v113_v7  ;;  %v110_v10 = vld [vmem:[%s335_s3 + $0x20] sm:$0xff]  ;;  %v109_v11 = vld [vmem:[%s335_s3 + $0x18] sm:$0xff]  ;;  %v108_v18 = vld [vmem:[%s335_s3 + $0x10] sm:$0xff] }
   0x7   :  { %v218_v12 = vld [vmem:[%s336_s4] ss:$0 sm:$0xff]  ;;  %v107_v19 = vld [vmem:[%s335_s3 + $0x8] sm:$0xff]  ;;  %v219_v21 = vld [vmem:[%s336_s4 + $0x1] ss:$0 sm:$0xff] }
   0x8   :  { %127 = vmatpush.msra.mxu2 %v112_v8  ;;  %v106_v20 = vld [vmem:[%s335_s3] sm:$0xff] }
   0x9   :  { %v220_v26 = vld [vmem:[%s336_s4 + $0x2] ss:$0 sm:$0xff] }
   0xa   :  { %98 = vmatpush.bf16.msra.mxu1 %v213_v5  ;;  %128 = vmatpush.msra.mxu2 %v111_v9 }
   0xc   :  { %129 = vmatpush.msra.mxu2 %v110_v10 }
   0xe   :  { %99 = vmatpush.bf16.msra.mxu1 %v212_v6  ;;  %130 = vmatpush.msra.mxu2 %v109_v11 }
  0x10   :  { %131 = vmatpush.msra.mxu2 %v108_v18 }
  0x12   :  { %132 = vmatpush.msra.mxu2 %v107_v19 }
  0x14   :  { %133 = vmatpush.msra.mxu2 %v106_v20 }
  0x82   :  { %v49_v13 = vpop.f32.mrf.mxu0 }
  0x83   :  { %v50_v14 = vadd.f32 %v218_v12, %v49_v13 }
  0x85   :  { %v53_v15 = vmax.f32 %v50_v14, 0.0 }
  0x87   :  { %v54_v16 = vpack.c.bf16 %v53_v15, %v53_v15 }
  0x89   :  { %209 = vmatmul.msk.bf16.vlgmr.msra.gmra.mxu1 %vm88_vm1, %v54_v16 }
  0x8a   :  { %v51_v17 = vpop.f32.mrf.mxu0 }
 0x106   :  { %v101_v22 = vpop.f32.mrf.mxu1 }
 0x107   :  { %v102_v23 = vadd.f32 %v219_v21, %v101_v22 }
 0x109   :  { %v105_v24 = vmax.f32 %v102_v23, 0.0 }
 0x10b   :  { %210 = vmatmul.msk.f32.vlgmr.msra.gmra.mxu2 %vm88_vm1, %v105_v24 }
 0x10e   :  { %v103_v25 = vpop.f32.mrf.mxu1 }
 0x18e   :  { %v135_v27 = vpop.f32.mrf.mxu2 }
 0x18f   :  { %v136_v28 = vadd.f32 %v220_v26, %v135_v27 }
 0x191   :  { %138 = vxpose.xlu0.b32.start.end [1/1] (short) (narrow) %v136_v28, 8 }
 0x235   :  { %v154_v29 = vpop.trf.xlu0 }
 0x236   :  { %171 = vst.msk [vmem:[#allocation2] sm:$0x7] %vm170_vm2, %v154_v29 }
 0x237   :  { %182 = dma.vmem_to_hbm [thread:$0]  %s178_s25, 64, %s180_s26, [#allocation3]  }
 0x238   :  { %245 = dma.done.wait [#allocation3], 64  }
 0x239   :  { %246 = vsyncadd [#allocation3], 4294967232 }
 0x23a   :  { %187 = vsyncpa [#allocation3], 1 }

</bundles_post_ra>
